<compile_context>
chip_gen: v6e
topology: v6e:2x2x1
jax: 0.10.0
libtpu: 0.0.40
codegen_flags: <defaults>
</compile_context>

<pallas_src>
import functools

import jax
import jax.numpy as jnp
from jax.experimental import pallas as pl
from jax.experimental.pallas import tpu as pltpu


# ----------------------------- helpers --------------------------------------


def _vmem_capacity_bytes():
    """Physical VMEM per TensorCore (generation-aware) with a safe fallback."""
    try:
        info = pltpu.get_tpu_info()
        for attr in ("vmem_capacity_bytes", "vmem_bytes", "vmem_size_bytes"):
            v = getattr(info, attr, None)
            if v:
                return int(v)
    except Exception:
        pass
    return 64 * 1024 * 1024  # v7x per-TC capacity: the most conservative.


def _round_block_c(bc, c):
    """Clamp a channel-block candidate to a Mosaic-legal sublane block."""
    bc = max(1, min(int(bc), c))
    if bc >= c or c <= 8:
        return c  # full channel dim is exempt from the 8-divisibility rule
    return max(8, (bc // 8) * 8)


def _largest_divisor_le(n, cap):
    """Largest divisor of n that is <= cap (>= 1)."""
    cap = max(1, min(int(cap), n))
    for d in range(cap, 0, -1):
        if n % d == 0:
            return d
    return 1


def _sum_nc(x):
    """Sum over axes (0, 2) of an (N, C, HW) tile -> (1, C, 1)."""
    return jnp.sum(jnp.sum(x, axis=2, keepdims=True), axis=0, keepdims=True)


# ----------------------------- kernels --------------------------------------


def _bn_fused_kernel(x_ref, w_ref, b_ref, o_ref, *, inv_m, eps):
    """Single-pass batch norm: whole (N, block_c, HW) slab resident in VMEM."""
    xf = x_ref[...].astype(jnp.float32)              # (N, bc, HW)
    s = _sum_nc(xf)                                  # (1, bc, 1)
    ss = _sum_nc(xf * xf)                            # (1, bc, 1)
    mean = s * jnp.float32(inv_m)
    var = jnp.maximum(ss * jnp.float32(inv_m) - mean * mean, 0.0)
    inv_std = jax.lax.rsqrt(var + jnp.float32(eps))  # EUP
    scale = w_ref[...] * inv_std                     # (1, bc, 1) f32
    shift = b_ref[...] - mean * scale
    o_ref[...] = (xf * scale + shift).astype(o_ref.dtype)


def _bn_stats_kernel(x_ref, sum_ref, sumsq_ref):
    """Accumulate per-channel sum / sum-of-squares across N-blocks."""

    @pl.when(pl.program_id(1) == 0)
    def _init():
        sum_ref[...] = jnp.zeros_like(sum_ref)
        sumsq_ref[...] = jnp.zeros_like(sumsq_ref)

    xf = x_ref[...].astype(jnp.float32)              # (bn, bc, HW)
    sum_ref[...] += _sum_nc(xf)
    sumsq_ref[...] += _sum_nc(xf * xf)


def _bn_apply_kernel(x_ref, w_ref, b_ref, sum_ref, sumsq_ref, o_ref, *, inv_m, eps):
    """Normalize one (bn, bc, HW) tile with precomputed channel statistics."""
    mean = sum_ref[...] * jnp.float32(inv_m)
    var = jnp.maximum(sumsq_ref[...] * jnp.float32(inv_m) - mean * mean, 0.0)
    inv_std = jax.lax.rsqrt(var + jnp.float32(eps))
    scale = w_ref[...] * inv_std
    shift = b_ref[...] - mean * scale
    xf = x_ref[...].astype(jnp.float32)
    o_ref[...] = (xf * scale + shift).astype(o_ref.dtype)


# ----------------------------- wrapper --------------------------------------


def meta_batchnorm2d_forward(x, weight, bias, *, eps=1e-5, vmem_budget_bytes=None):
    """Training-mode BatchNorm2d forward.  x: (N, C, H, W); weight/bias: (C,)."""
    n, c, h, w = x.shape
    hw = h * w
    total = n * c * hw
    m = n * hw
    inv_m = 1.0 / float(m)
    itemsize = jnp.dtype(x.dtype).itemsize

    # Free layout views (no HBM passes): NCHW -> (N, C, HW); params -> (1, C, 1) f32.
    x3 = x.reshape(n, c, hw)
    w3 = jnp.asarray(weight, jnp.float32).reshape(1, c, 1)
    b3 = jnp.asarray(bias, jnp.float32).reshape(1, c, 1)

    # Generation-aware budget for the double-buffered working set (2x in + 2x out).
    vmem_cap = _vmem_capacity_bytes()
    if vmem_budget_bytes is None:
        vmem_budget_bytes = int(vmem_cap * 0.45)   # ~28 MiB v7x, ~57 MiB v5e/v6e
    vmem_limit = int(min(vmem_cap * 3 // 4, vmem_budget_bytes + (16 << 20)))

    min_bc = c if c <= 8 else 8
    per_c_bytes = n * hw * itemsize                 # one channel at full N*HW
    fused_ok = 4 * min_bc * per_c_bytes <= vmem_budget_bytes

    out_shape3 = jax.ShapeDtypeStruct((n, c, hw), x.dtype)

    if fused_ok:
        # -------- fused single pass: 1 HBM read + 1 HBM write of x ----------
        bc = _round_block_c(vmem_budget_bytes // (4 * per_c_bytes), c)
        if c >= 16 and bc >= c:
            bc = _round_block_c(c // 2, c)   # >= 2 channel blocks: both v7x TCs busy
        grid = (pl.cdiv(c, bc),)

        kernel = functools.partial(_bn_fused_kernel, inv_m=inv_m, eps=float(eps))
        out3 = pl.pallas_call(
            kernel,
            out_shape=out_shape3,
            grid_spec=pltpu.PrefetchScalarGridSpec(
                num_scalar_prefetch=0,
                grid=grid,
                in_specs=[
                    pl.BlockSpec((n, bc, hw), lambda ci: (0, ci, 0)),
                    pl.BlockSpec((1, bc, 1), lambda ci: (0, ci, 0)),
                    pl.BlockSpec((1, bc, 1), lambda ci: (0, ci, 0)),
                ],
                out_specs=pl.BlockSpec((n, bc, hw), lambda ci: (0, ci, 0)),
            ),
            compiler_params=pltpu.CompilerParams(
                dimension_semantics=("parallel",),
                vmem_limit_bytes=vmem_limit,
            ),
            cost_estimate=pl.CostEstimate(
                flops=5 * total,
                transcendentals=c,
                bytes_accessed=2 * total * itemsize + 8 * c,
            ),
        )(x3, w3, b3)
        return out3.reshape(n, c, h, w)

    # -------- two passes: stats (tiled over N) then apply --------------------
    # TODO(synk): for extreme H*W where even an (8, 1, HW) row blows the VMEM
    # budget, the spatial axis itself would need tiling; not implemented here.
    bc = min_bc
    per_row_bytes = bc * hw * itemsize
    bn_cap = max(1, vmem_budget_bytes // (4 * per_row_bytes))
    bn = _largest_divisor_le(n, bn_cap)   # exact divisor -> no masked reduction rows
    grid = (pl.cdiv(c, bc), n // bn)

    stats_shape = jax.ShapeDtypeStruct((1, c, 1), jnp.float32)
    stats_spec = pl.BlockSpec((1, bc, 1), lambda ci, ni: (0, ci, 0))
    x_spec = pl.BlockSpec((bn, bc, hw), lambda ci, ni: (ni, ci, 0))

    ch_sum, ch_sumsq = pl.pallas_call(
        _bn_stats_kernel,
        out_shape=(stats_shape, stats_shape),
        grid_spec=pltpu.PrefetchScalarGridSpec(
            num_scalar_prefetch=0,
            grid=grid,
            in_specs=[x_spec],
            out_specs=(stats_spec, stats_spec),
        ),
        compiler_params=pltpu.CompilerParams(
            dimension_semantics=("parallel", "arbitrary"),
            vmem_limit_bytes=vmem_limit,
        ),
        cost_estimate=pl.CostEstimate(
            flops=3 * total,
            transcendentals=0,
            bytes_accessed=total * itemsize + 8 * c,
        ),
    )(x3)

    kernel = functools.partial(_bn_apply_kernel, inv_m=inv_m, eps=float(eps))
    out3 = pl.pallas_call(
        kernel,
        out_shape=out_shape3,
        grid_spec=pltpu.PrefetchScalarGridSpec(
            num_scalar_prefetch=0,
            grid=grid,
            in_specs=[
                x_spec,
                pl.BlockSpec((1, bc, 1), lambda ci, ni: (0, ci, 0)),
                pl.BlockSpec((1, bc, 1), lambda ci, ni: (0, ci, 0)),
                stats_spec,
                stats_spec,
            ],
            out_specs=pl.BlockSpec((bn, bc, hw), lambda ci, ni: (ni, ci, 0)),
        ),
        compiler_params=pltpu.CompilerParams(
            dimension_semantics=("parallel", "parallel"),
            vmem_limit_bytes=vmem_limit,
        ),
        cost_estimate=pl.CostEstimate(
            flops=2 * total + 6 * c,
            transcendentals=c,
            bytes_accessed=2 * total * itemsize + 16 * c,
        ),
    )(x3, w3, b3, ch_sum, ch_sumsq)
    return out3.reshape(n, c, h, w)


# ----------------------------- reference & test ------------------------------


def batchnorm2d_reference(x, weight, bias, eps=1e-5):
    """Pure-JAX reference matching F.batch_norm in training mode."""
    mean = jnp.mean(x, axis=(0, 2, 3), keepdims=True)
    var = jnp.var(x, axis=(0, 2, 3), keepdims=True)  # biased, like F.batch_norm
    xn = (x - mean) * jax.lax.rsqrt(var + eps)
    return xn * weight.reshape(1, -1, 1, 1) + bias.reshape(1, -1, 1, 1)


if __name__ == "__main__":
    n, c, h, w = 2, 4, 16, 16
    key = jax.random.PRNGKey(0)
    kx, kw, kb = jax.random.split(key, 3)

    x = jax.random.normal(kx, (n, c, h, w), jnp.float32)
    # nn.BatchNorm2d initializes weight=1, bias=0; perturb so the affine path
    # is actually exercised by the correctness check.
    weight = 1.0 + 0.1 * jax.random.normal(kw, (c,), jnp.float32)
    bias = 0.1 * jax.random.normal(kb, (c,), jnp.float32)

    ref = batchnorm2d_reference(x, weight, bias, eps=1e-5)

    # 1) Fused single-pass path (default budget: whole slab fits VMEM).
    out = jax.block_until_ready(meta_batchnorm2d_forward(x, weight, bias, eps=1e-5))
    assert out.shape == (n, c, h, w) and out.dtype == x.dtype
    assert jnp.allclose(out, ref, atol=1e-4, rtol=1e-4), "fused path mismatch"

    # 2) Force the tiled two-pass (stats + apply) path with a tiny VMEM budget.
    out2 = jax.block_until_ready(
        meta_batchnorm2d_forward(x, weight, bias, eps=1e-5,
                                 vmem_budget_bytes=16 * 1024))
    assert jnp.allclose(out2, ref, atol=1e-4, rtol=1e-4), "two-pass path mismatch"

    # 3) Narrow dtype stays narrow through DMA and on the output (bf16).
    xb = x.astype(jnp.bfloat16)
    outb = jax.block_until_ready(meta_batchnorm2d_forward(xb, weight, bias, eps=1e-5))
    assert outb.dtype == jnp.bfloat16
    refb = batchnorm2d_reference(xb.astype(jnp.float32), weight, bias, eps=1e-5)
    assert jnp.allclose(outb.astype(jnp.float32), refb, atol=5e-2, rtol=5e-2), \
        "bf16 path mismatch"

    print("KERNEL_OK")
</pallas_src>

<mosaic_0001>
module attributes {stable_mosaic.version = 11 : i64} {
  func.func @_bn_fused_kernel(%arg0: i32, %arg1: memref<2x4x256xf32, #tpu.memory_space<vmem>>, %arg2: memref<1x4x1xf32, #tpu.memory_space<vmem>>, %arg3: memref<1x4x1xf32, #tpu.memory_space<vmem>>, %arg4: memref<2x4x256xf32, #tpu.memory_space<vmem>>) attributes {dimension_semantics = [#tpu.dimension_semantics<parallel>], iteration_bounds = array<i64: 1>, scalar_prefetch = 0 : i64, scratch_operands = 0 : i64, tpu.core_type = #tpu.core_type<tc>, window_params = [{transform_indices = @transform_0, window_bounds = array<i64: 2, 4, 256>}, {transform_indices = @transform_1, window_bounds = array<i64: 1, 4, 1>}, {transform_indices = @transform_2, window_bounds = array<i64: 1, 4, 1>}, {transform_indices = @transform_3, window_bounds = array<i64: 2, 4, 256>}]} {
    %c0 = arith.constant 0 : index
    %c0_0 = arith.constant 0 : index
    %c0_1 = arith.constant 0 : index
    %0 = vector.load %arg1[%c0, %c0_0, %c0_1] : memref<2x4x256xf32, #tpu.memory_space<vmem>>, vector<2x4x256xf32>
    %cst = arith.constant dense<0.000000e+00> : vector<2x4xf32>
    %1 = vector.multi_reduction <add>, %0, %cst [2] : vector<2x4x256xf32> to vector<2x4xf32>
    %2 = vector.shape_cast %1 : vector<2x4xf32> to vector<2x4x1xf32>
    %cst_2 = arith.constant dense<0.000000e+00> : vector<4x1xf32>
    %3 = vector.multi_reduction <add>, %2, %cst_2 [0] : vector<2x4x1xf32> to vector<4x1xf32>
    %4 = vector.shape_cast %3 : vector<4x1xf32> to vector<1x4x1xf32>
    %5 = arith.mulf %0, %0 : vector<2x4x256xf32>
    %cst_3 = arith.constant dense<0.000000e+00> : vector<2x4xf32>
    %6 = vector.multi_reduction <add>, %5, %cst_3 [2] : vector<2x4x256xf32> to vector<2x4xf32>
    %7 = vector.shape_cast %6 : vector<2x4xf32> to vector<2x4x1xf32>
    %cst_4 = arith.constant dense<0.000000e+00> : vector<4x1xf32>
    %8 = vector.multi_reduction <add>, %7, %cst_4 [0] : vector<2x4x1xf32> to vector<4x1xf32>
    %9 = vector.shape_cast %8 : vector<4x1xf32> to vector<1x4x1xf32>
    %cst_5 = arith.constant 0.001953125 : f32
    %10 = vector.broadcast %cst_5 : f32 to vector<1x4x1xf32>
    %11 = arith.mulf %4, %10 : vector<1x4x1xf32>
    %cst_6 = arith.constant 0.001953125 : f32
    %12 = vector.broadcast %cst_6 : f32 to vector<1x4x1xf32>
    %13 = arith.mulf %9, %12 : vector<1x4x1xf32>
    %14 = arith.mulf %11, %11 : vector<1x4x1xf32>
    %15 = arith.subf %13, %14 : vector<1x4x1xf32>
    %cst_7 = arith.constant 0.000000e+00 : f32
    %16 = vector.broadcast %cst_7 : f32 to vector<1x4x1xf32>
    %17 = arith.maximumf %15, %16 : vector<1x4x1xf32>
    %cst_8 = arith.constant 9.99999974E-6 : f32
    %18 = vector.broadcast %cst_8 : f32 to vector<1x4x1xf32>
    %19 = arith.addf %17, %18 : vector<1x4x1xf32>
    %20 = math.rsqrt %19 : vector<1x4x1xf32>
    %c0_9 = arith.constant 0 : index
    %c0_10 = arith.constant 0 : index
    %c0_11 = arith.constant 0 : index
    %21 = vector.load %arg2[%c0_9, %c0_10, %c0_11] : memref<1x4x1xf32, #tpu.memory_space<vmem>>, vector<1x4x1xf32>
    %22 = arith.mulf %21, %20 : vector<1x4x1xf32>
    %c0_12 = arith.constant 0 : index
    %c0_13 = arith.constant 0 : index
    %c0_14 = arith.constant 0 : index
    %23 = vector.load %arg3[%c0_12, %c0_13, %c0_14] : memref<1x4x1xf32, #tpu.memory_space<vmem>>, vector<1x4x1xf32>
    %24 = arith.mulf %11, %22 : vector<1x4x1xf32>
    %25 = arith.subf %23, %24 : vector<1x4x1xf32>
    %26 = vector.broadcast %22 : vector<1x4x1xf32> to vector<2x4x256xf32>
    %27 = arith.mulf %0, %26 : vector<2x4x256xf32>
    %28 = vector.broadcast %25 : vector<1x4x1xf32> to vector<2x4x256xf32>
    %29 = arith.addf %27, %28 : vector<2x4x256xf32>
    %c0_15 = arith.constant 0 : index
    %c0_16 = arith.constant 0 : index
    %c0_17 = arith.constant 0 : index
    %30 = vector.load %arg4[%c0_15, %c0_16, %c0_17] : memref<2x4x256xf32, #tpu.memory_space<vmem>>, vector<2x4x256xf32>
    tpu.vector_store %arg4[%c0_15, %c0_16, %c0_17], %29 {strides = array<i32>} : memref<2x4x256xf32, #tpu.memory_space<vmem>>, vector<2x4x256xf32>,
    return
  }
  func.func @transform_0(%arg0: i32) -> (i32, i32, i32) {
    %c0_i32 = arith.constant 0 : i32
    %c0_i32_0 = arith.constant 0 : i32
    %c0_i32_1 = arith.constant 0 : i32
    return %c0_i32, %arg0, %c0_i32_0 : i32, i32, i32
  }
  func.func @transform_1(%arg0: i32) -> (i32, i32, i32) {
    %c0_i32 = arith.constant 0 : i32
    %c0_i32_0 = arith.constant 0 : i32
    %c0_i32_1 = arith.constant 0 : i32
    return %c0_i32, %arg0, %c0_i32_0 : i32, i32, i32
  }
  func.func @transform_2(%arg0: i32) -> (i32, i32, i32) {
    %c0_i32 = arith.constant 0 : i32
    %c0_i32_0 = arith.constant 0 : i32
    %c0_i32_1 = arith.constant 0 : i32
    return %c0_i32, %arg0, %c0_i32_0 : i32, i32, i32
  }
  func.func @transform_3(%arg0: i32) -> (i32, i32, i32) {
    %c0_i32 = arith.constant 0 : i32
    %c0_i32_0 = arith.constant 0 : i32
    %c0_i32_1 = arith.constant 0 : i32
    return %c0_i32, %arg0, %c0_i32_0 : i32, i32, i32
  }
}

</mosaic_0001>

<bundles_post_ra>
// kernel: tpu_custom_call.1
= control target key start
LH: loop header
LB: loop body
LE: loop exit
PB: predicated region body
PF: predicated region fallthrough
CT: control target
= control target key end

     0   :  { %8 = vsyncpa [#allocation3], 0  ;;  %s259_s0 = inlined_call_operand.hbm [shape: f32[2,4,256], index: 0, kind: input, shape index: {}]   ;;  %s260_s1 = inlined_call_operand.vmem [shape: f32[1,4,1], index: 1, kind: input, shape index: {}]   ;;  %s261_s2 = inlined_call_operand.vmem [shape: f32[1,4,1], index: 2, kind: input, shape index: {}]   ;;  %s262_s3 = inlined_call_operand.hbm [shape: f32[2,4,256], index: 3, kind: output, shape index: {}]  }
   0x1   :  { %9 = vsyncpa [#allocation4], 0  ;;  %s187_s12 = smov [#allocation2]  }
   0x2   :  { %s15_s13 = sshll.u32 %s187_s12, 4  ;;  %s16_s13 = int_to_ptr.vmem [resolvable:$true] %s15_s13 }
   0x3   :  { %s151_s14 = scalar_lea.vmem %s16_s13, 256  ;;  %p156_p1 = scmp.lt.s32.totalorder %s16_s13, %s16_s13 }
   0x4   :  { %p152_p0 = scmp.ne.s32.totalorder %s16_s13, %s151_s14  ;;  %p157_p2 = scmp.lt.s32.totalorder %s151_s14, %s151_s14 }
   0x6   :  { %p158_p3 = por %p157_p2, %p156_p1 }
   0x8   :  { %p159_p4 = pnand %p158_p3, %p152_p0 }
   0xa   :  { %162 = shalt.err (!%p159_p4)
}
   0xb   :  { %s188_s15 = smov 128   ;;  %s189_s16 = smov 8  }
   0xc   :  { %21 = dma.hbm_to_vmem [thread:$0]  %s259_s0, 256, %s16_s13, [#allocation3], %s188_s15, %s188_s15, %s189_s16  }
   0xd   :  { %183 = dma.done.wait [#allocation3], 256  }
   0xe   :  { %184 = vsyncadd [#allocation3], 4294967040  ;;  %vm37_vm0 = vcmask 1043456   ;;  %v219_v0 = vld [vmem:[#allocation2] sm:$0xff]  ;;  %v221_v1 = vld [vmem:[#allocation2 + $0x8] sm:$0xff]  ;;  %v190_v20 = vmov 0   ;;  %v91_v45 = vlaneseq }
   0xf   :  { %v33_v2 = vcombine.high %v219_v0, %v219_v0  ;;  %v38_v3 = vsel %vm37_vm0, %v219_v0, 0.0  ;;  %v51_v4 = vmul.f32 %v219_v0, %v219_v0  ;;  %v34_v5 = vcombine.high %v221_v1, %v221_v1  ;;  %137 = vset.pattern.permute.xlu0 %v190_v20  ;;  %138 = vset.pattern.permute.xlu1 %v190_v20  ;;  %v79_v37 = vld [vmem:[%s260_s1] sm:$0xf]  ;;  %s192_s1 = smov [#allocation5]  }
  0x10   :  { %v43_v6 = vsel %vm37_vm0, %v221_v1, 0.0  ;;  %v52_v7 = vmul.f32 %v221_v1, %v221_v1  ;;  %v81_v40 = vld [vmem:[%s261_s2] sm:$0xf]  ;;  %v191_v43 = vmov 839922192   ;;  %v92_v47 = vshrl.u32 %v91_v45, 7 }
  0x11   :  { %v39_v8 = vsel %vm37_vm0, %v33_v2, 0.0  ;;  %v55_v9 = vcombine.high %v51_v4, %v51_v4  ;;  %v59_v10 = vsel %vm37_vm0, %v51_v4, 0.0  ;;  %v44_v11 = vsel %vm37_vm0, %v34_v5, 0.0  ;;  %s119_s22 = sshll.u32 %s192_s1, 4  ;;  %s120_s22 = int_to_ptr.vmem [resolvable:$true] %s119_s22 }
  0x12   :  { %v40_v12 = vadd.f32 %v39_v8, %v38_v3  ;;  %v56_v13 = vcombine.high %v52_v7, %v52_v7  ;;  %v64_v15 = vsel %vm37_vm0, %v52_v7, 0.0  ;;  %v45_v17 = vadd.f32 %v44_v11, %v43_v6  ;;  %s163_s2 = scalar_lea.vmem %s120_s22, 256  ;;  %p168_p6 = scmp.lt.s32.totalorder %s120_s22, %s120_s22 }
  0x13   :  { %v60_v14 = vsel %vm37_vm0, %v55_v9, 0.0  ;;  %v89_v44 = vunpack.c.l.s4 %v191_v43  ;;  %p164_p5 = scmp.ne.s32.totalorder %s120_s22, %s163_s2  ;;  %p169_p7 = scmp.lt.s32.totalorder %s163_s2, %s163_s2 }
  0x14   :  { %41 = vadd.xlane.f32.xlu0 %v40_v12  ;;  %v61_v16 = vadd.f32 %v60_v14, %v59_v10  ;;  %v65_v18 = vsel %vm37_vm0, %v56_v13, 0.0 }
  0x15   :  { %v66_v19 = vadd.f32 %v65_v18, %v64_v15  ;;  %v90_v46 = vunpack.c.0.s8 %v89_v44  ;;  %p170_p8 = por %p169_p7, %p168_p6 }
  0x16   :  { %62 = vadd.xlane.f32.xlu1 %v61_v16 }
  0x17   :  { %v93_v48 = vsub.s32 %v90_v46, %v92_v47  ;;  %p171_p9 = pnand %p170_p8, %p164_p5 }
  0x18   :  { %46 = vadd.xlane.f32.xlu0 %v45_v17 }
  0x1a   :  { %67 = vadd.xlane.f32.xlu1 %v66_v19 }
  0x9d   :  { %v42_v21 = vpop.xlane.xlu0 %41 }
  0x9e   :  { %v48_v24 = vsel %vm37_vm0, %v42_v21, 0.0 }
  0x9f   :  { %v63_v22 = vpop.xlane.xlu1 %62 }
  0xa0   :  { %v69_v28 = vsel %vm37_vm0, %v63_v22, 0.0 }
  0xa1   :  { %v47_v23 = vpop.xlane.xlu0 %46 }
  0xa2   :  { %v49_v25 = vsel %vm37_vm0, %v47_v23, 0.0 }
  0xa3   :  { %v50_v26 = vadd.f32 %v49_v25, %v48_v24  ;;  %v68_v27 = vpop.xlane.xlu1 %67 }
  0xa4   :  { %v70_v29 = vsel %vm37_vm0, %v68_v27, 0.0 }
  0xa5   :  { %v72_v30 = vmul.f32 0.001953125, %v50_v26  ;;  %v71_v31 = vadd.f32 %v70_v29, %v69_v28 }
  0xa7   :  { %v74_v32 = vmul.f32 %v72_v30, %v72_v30  ;;  %v73_v33 = vmul.f32 0.001953125, %v71_v31 }
  0xa9   :  { %v75_v34 = vsub.f32 %v73_v33, %v74_v32 }
  0xab   :  { %v76_v35 = vmax.f32 %v75_v34, 0.0 }
  0xad   :  { %v77_v36 = vadd.f32 1e-05, %v76_v35 }
  0xaf   :  { %141 = vrsqrt.f32 %v77_v36 }
  0xbc   :  { %v142_v38 = vpop.eup %141 }
  0xbd   :  { %v80_v39 = vmul.f32 %v142_v38, %v79_v37 }
  0xbf   :  { %86 = vperm.xlu0 %137, %v80_v39   ;;  %v82_v41 = vmul.f32 %v80_v39, %v72_v30 }
  0xc1   :  { %v83_v42 = vsub.f32 %v81_v40, %v82_v41 }
  0xc3   :  { %100 = vperm.xlu1 %138, %v83_v42  }
 0x13a   :  { %v87_v49 = vpop.permute.xlu0 %86 }
 0x13b   :  { %v94_v50 = vrot.slane %v87_v49, %v93_v48 }
 0x13d   :  { %v96_v52 = vmul.f32 %v94_v50, %v219_v0  ;;  %v97_v53 = vmul.f32 %v94_v50, %v221_v1 }
 0x13e   :  { %v101_v51 = vpop.permute.xlu1 %100 }
 0x13f   :  { %v108_v54 = vrot.slane %v101_v51, %v93_v48 }
 0x141   :  { %v110_v55 = vadd.f32 %v108_v54, %v96_v52  ;;  %v111_v56 = vadd.f32 %v108_v54, %v97_v53 }
 0x143   :  { %112 = vst [vmem:[#allocation5] sm:$0xff] %v110_v55  ;;  %113 = vst [vmem:[#allocation5 + $0x8] sm:$0xff] %v111_v56 }
 0x144   :  { %174 = shalt.err (!%p171_p9)
}
 0x145   :  { %125 = dma.vmem_to_hbm [thread:$0]  %s120_s22, 256, %s262_s3, [#allocation4], %s188_s15, %s188_s15, %s189_s16  }
 0x146   :  { %185 = dma.done.wait [#allocation4], 256  }
 0x147   :  { %186 = vsyncadd [#allocation4], 4294967040 }
 0x148   :  { %129 = vsyncpa [#allocation3], 1 }
 0x149   :  { %130 = vsyncpa [#allocation4], 1 }

</bundles_post_ra>
